<compile_context>
chip_gen: v7x
topology: tpu7x:2x2x1
jax: 0.10.0
libtpu: 0.0.40
codegen_flags: <defaults>
</compile_context>

<pallas_src>
import jax
import jax.numpy as jnp
import numpy as np
from jax import lax
from jax.experimental import pallas as pl
from jax.experimental.pallas import tpu as pltpu


def channel_attention_kernel(x_ref, w1_ref, w2_ref, o_ref):
    # x_ref: (NB, C, HW) block of NB batch elements.

    # ---- pooled fc chain (tiny; MXU/VPU/EUP have huge slack) ----
    # Both "max_pool" and "avg_pool" in the source are AdaptiveMaxPool2d, so
    # one max-reduction serves both branches.
    pool = jnp.max(x_ref[...], axis=-1)                           # (NB, C)

    # fc1 -> relu -> fc2 on lane-dense row-major pooled vectors.
    h = lax.dot_general(pool, w1_ref[...], (((1,), (1,)), ((), ())),
                        preferred_element_type=jnp.float32)       # (NB, C//r)
    h = jnp.maximum(h, 0.0)
    y = lax.dot_general(h, w2_ref[...], (((1,), (1,)), ((), ())),
                        preferred_element_type=jnp.float32)       # (NB, C)

    # y_max + y_avg == 2*y exactly (branches identical in the source module).
    att = jax.nn.sigmoid(2.0 * y)                                 # (NB, C)

    # ---- broadcast multiply ----
    # Re-read the pipelined VMEM input buffer (3 vld slots/cycle are nearly
    # free) instead of keeping the whole block live in vregs across the pool:
    # avoids spill copies that would load the 1-2/cycle vst slot.
    o_ref[...] = (x_ref[...] * att[:, :, None]).astype(o_ref.dtype)


def _vmem_budget():
    """(vmem_limit_bytes, per_buffer_budget_bytes), generation-aware."""
    try:
        phys = pltpu.get_tpu_info().vmem_capacity_bytes
    except Exception:
        phys = 64 << 20  # conservative fallback (v7x per-TensorCore VMEM)
    vmem_limit = int(phys) * 3 // 4
    # Pipeline footprint ~ 4x block (input x2 + output x2) + weights + headroom.
    per_buffer_budget = max(1 << 20, vmem_limit // 6)
    return vmem_limit, per_buffer_budget


def _pick_batch_block(B, per_sample_bytes, budget_bytes, min_steps=2):
    """Batch-block size: fits the per-buffer budget and leaves >= min_steps
    grid steps (so megacore sharding / pipeline overlap are possible)."""
    nb_budget = max(1, budget_bytes // max(1, per_sample_bytes))
    nb_steps = max(1, B // min_steps) if B >= min_steps else B
    return int(max(1, min(B, nb_budget, nb_steps)))


def channel_attention(x, w1, w2):
    """x: (B, C, H, W) float32; w1: (C//r, C); w2: (C, C//r)."""
    B, C, H, W = x.shape
    HW = H * W
    Cr = w1.shape[0]
    x_flat = x.reshape(B, C, HW)

    vmem_limit, budget = _vmem_budget()
    per_sample_bytes = C * HW * x.dtype.itemsize
    NB = _pick_batch_block(B, per_sample_bytes, budget)
    grid = (pl.cdiv(B, NB),)   # partial last block is fine: rows are independent

    cost = pl.CostEstimate(
        flops=2 * B * C * HW + 4 * B * C * Cr,     # pool+multiply + 2 small matmuls
        transcendentals=B * C,                     # sigmoid
        bytes_accessed=2 * x.nbytes + w1.nbytes + w2.nbytes,
    )

    out_flat = pl.pallas_call(
        channel_attention_kernel,
        out_shape=jax.ShapeDtypeStruct((B, C, HW), x.dtype),
        grid_spec=pltpu.PrefetchScalarGridSpec(
            num_scalar_prefetch=0,
            grid=grid,
            in_specs=[
                pl.BlockSpec((NB, C, HW), lambda b: (b, 0, 0)),
                pl.BlockSpec(w1.shape, lambda b: (0, 0)),
                pl.BlockSpec(w2.shape, lambda b: (0, 0)),
            ],
            out_specs=pl.BlockSpec((NB, C, HW), lambda b: (b, 0, 0)),
        ),
        compiler_params=pltpu.CompilerParams(
            dimension_semantics=("parallel",),
            vmem_limit_bytes=vmem_limit,
        ),
        cost_estimate=cost,
    )(x_flat, w1, w2)

    return out_flat.reshape(B, C, H, W)


def _reference(x, w1, w2):
    # Pure-JAX reference mirroring the PyTorch forward exactly.
    max_pool = jnp.max(x, axis=(2, 3))               # AdaptiveMaxPool2d
    avg_pool = jnp.max(x, axis=(2, 3))               # also MaxPool (source quirk)
    ym = jnp.maximum(max_pool @ w1.T, 0.0) @ w2.T
    ya = jnp.maximum(avg_pool @ w1.T, 0.0) @ w2.T
    att = jax.nn.sigmoid(ym + ya)
    return x * att[:, :, None, None]


if __name__ == "__main__":
    B, C, H, W = 4, 32, 16, 16
    ratio = 4

    key = jax.random.PRNGKey(0)
    kx, k1, k2 = jax.random.split(key, 3)

    x = jax.random.uniform(kx, (B, C, H, W), dtype=jnp.float32)

    # Deterministic weight init (Kaiming-uniform-like bounds, nn.Linear default).
    bound1 = 1.0 / np.sqrt(C)
    bound2 = 1.0 / np.sqrt(C // ratio)
    w1 = jax.random.uniform(k1, (C // ratio, C), jnp.float32, -bound1, bound1)
    w2 = jax.random.uniform(k2, (C, C // ratio), jnp.float32, -bound2, bound2)

    out = channel_attention(x, w1, w2)
    out = jax.block_until_ready(out)

    ref = _reference(x, w1, w2)
    np.testing.assert_allclose(np.asarray(out), np.asarray(ref), rtol=1e-5, atol=1e-5)

    print("KERNEL_OK")
</pallas_src>

<mosaic_0001>
module attributes {stable_mosaic.version = 11 : i64} {
  func.func @channel_attention_kernel(%arg0: i32, %arg1: memref<2x32x256xf32, #tpu.memory_space<vmem>>, %arg2: memref<8x32xf32, #tpu.memory_space<vmem>>, %arg3: memref<32x8xf32, #tpu.memory_space<vmem>>, %arg4: memref<2x32x256xf32, #tpu.memory_space<vmem>>) attributes {dimension_semantics = [#tpu.dimension_semantics<parallel>], iteration_bounds = array<i64: 2>, scalar_prefetch = 0 : i64, scratch_operands = 0 : i64, tpu.core_type = #tpu.core_type<tc>, window_params = [{transform_indices = @transform_0, window_bounds = array<i64: 2, 32, 256>}, {pipeline_mode = #tpu.pipeline_mode<synchronous>, transform_indices = @transform_1, window_bounds = array<i64: 8, 32>}, {pipeline_mode = #tpu.pipeline_mode<synchronous>, transform_indices = @transform_2, window_bounds = array<i64: 32, 8>}, {transform_indices = @transform_3, window_bounds = array<i64: 2, 32, 256>}]} {
    %c0 = arith.constant 0 : index
    %c0_0 = arith.constant 0 : index
    %c0_1 = arith.constant 0 : index
    %0 = vector.load %arg1[%c0, %c0_0, %c0_1] : memref<2x32x256xf32, #tpu.memory_space<vmem>>, vector<2x32x256xf32>
    %cst = arith.constant dense<0xFF800000> : vector<2x32xf32>
    %1 = vector.multi_reduction <maximumf>, %0, %cst [2] : vector<2x32x256xf32> to vector<2x32xf32>
    %c0_2 = arith.constant 0 : index
    %c0_3 = arith.constant 0 : index
    %2 = vector.load %arg2[%c0_2, %c0_3] : memref<8x32xf32, #tpu.memory_space<vmem>>, vector<8x32xf32>
    %cst_4 = arith.constant dense<0.000000e+00> : vector<2x8xf32>
    %3 = tpu.matmul %1, %2, %cst_4 {dimension_numbers = #tpu.dot_dimension_numbers<[1], [1], [0], [0], [0, 0, 1, 0], [], []>} : vector<2x32xf32>, vector<8x32xf32>, vector<2x8xf32> -> vector<2x8xf32>
    %cst_5 = arith.constant 0.000000e+00 : f32
    %4 = vector.broadcast %cst_5 : f32 to vector<2x8xf32>
    %5 = arith.maximumf %3, %4 : vector<2x8xf32>
    %c0_6 = arith.constant 0 : index
    %c0_7 = arith.constant 0 : index
    %6 = vector.load %arg3[%c0_6, %c0_7] : memref<32x8xf32, #tpu.memory_space<vmem>>, vector<32x8xf32>
    %cst_8 = arith.constant dense<0.000000e+00> : vector<2x32xf32>
    %7 = tpu.matmul %5, %6, %cst_8 {dimension_numbers = #tpu.dot_dimension_numbers<[1], [1], [0], [0], [0, 0, 1, 0], [], []>} : vector<2x8xf32>, vector<32x8xf32>, vector<2x32xf32> -> vector<2x32xf32>
    %cst_9 = arith.constant 2.000000e+00 : f32
    %8 = vector.broadcast %cst_9 : f32 to vector<2x32xf32>
    %9 = arith.mulf %8, %7 : vector<2x32xf32>
    %10 = arith.negf %9 : vector<2x32xf32>
    %11 = math.exp %10 : vector<2x32xf32>
    %cst_10 = arith.constant 1.000000e+00 : f32
    %12 = vector.broadcast %cst_10 : f32 to vector<2x32xf32>
    %13 = arith.addf %12, %11 : vector<2x32xf32>
    %14 = arith.divf %12, %13 : vector<2x32xf32>
    %c0_11 = arith.constant 0 : index
    %c0_12 = arith.constant 0 : index
    %c0_13 = arith.constant 0 : index
    %15 = vector.load %arg1[%c0_11, %c0_12, %c0_13] : memref<2x32x256xf32, #tpu.memory_space<vmem>>, vector<2x32x256xf32>
    %16 = vector.shape_cast %14 : vector<2x32xf32> to vector<2x32x1xf32>
    %17 = vector.broadcast %16 : vector<2x32x1xf32> to vector<2x32x256xf32>
    %18 = arith.mulf %15, %17 : vector<2x32x256xf32>
    %c0_14 = arith.constant 0 : index
    %c0_15 = arith.constant 0 : index
    %c0_16 = arith.constant 0 : index
    %19 = vector.load %arg4[%c0_14, %c0_15, %c0_16] : memref<2x32x256xf32, #tpu.memory_space<vmem>>, vector<2x32x256xf32>
    tpu.vector_store %arg4[%c0_14, %c0_15, %c0_16], %18 {strides = array<i32>} : memref<2x32x256xf32, #tpu.memory_space<vmem>>, vector<2x32x256xf32>,
    return
  }
  func.func @transform_0(%arg0: i32) -> (i32, i32, i32) {
    %c0_i32 = arith.constant 0 : i32
    %c0_i32_0 = arith.constant 0 : i32
    %c0_i32_1 = arith.constant 0 : i32
    return %arg0, %c0_i32, %c0_i32_0 : i32, i32, i32
  }
  func.func @transform_1(%arg0: i32) -> (i32, i32) {
    %c0_i32 = arith.constant 0 : i32
    %c0_i32_0 = arith.constant 0 : i32
    %c0_i32_1 = arith.constant 0 : i32
    return %c0_i32, %c0_i32_0 : i32, i32
  }
  func.func @transform_2(%arg0: i32) -> (i32, i32) {
    %c0_i32 = arith.constant 0 : i32
    %c0_i32_0 = arith.constant 0 : i32
    %c0_i32_1 = arith.constant 0 : i32
    return %c0_i32, %c0_i32_0 : i32, i32
  }
  func.func @transform_3(%arg0: i32) -> (i32, i32, i32) {
    %c0_i32 = arith.constant 0 : i32
    %c0_i32_0 = arith.constant 0 : i32
    %c0_i32_1 = arith.constant 0 : i32
    return %arg0, %c0_i32, %c0_i32_0 : i32, i32, i32
  }
}

</mosaic_0001>

<bundles_post_ra>
// kernel: tpu_custom_call.1
= control target key start
LH: loop header
LB: loop body
LE: loop exit
PB: predicated region body
PF: predicated region fallthrough
CT: control target
= control target key end

     0   :  { %8 = vsyncpa [#allocation3], 0  ;;  %s1133_s0 = inlined_call_operand.hbm [shape: f32[4,32,256], index: 0, kind: input, shape index: {}]   ;;  %s1134_s1 = inlined_call_operand.vmem [shape: f32[8,32], index: 1, kind: input, shape index: {}]   ;;  %s1135_s2 = inlined_call_operand.vmem [shape: f32[32,8], index: 2, kind: input, shape index: {}]   ;;  %s1136_s3 = inlined_call_operand.hbm [shape: f32[4,32,256], index: 3, kind: output, shape index: {}]  }
   0x1   :  { %10 = vsyncpa [#allocation3 + $0x1], 0 }
   0x2   :  { %11 = vsyncpa [#allocation4], 0 }
   0x3   :  { %13 = vsyncpa [#allocation4 + $0x1], 0  ;;  %s864_s12 = smov 0   ;;  %s866_s13 = smov 0  }
   0x4   :  { %s868_s14 = smov 0   ;;  %s870_s15 = smov 0  }
   0x5 LB: > { %s885_s16 = sadd.s32 4294967295, %s833_s15   ;;  %s621_s17 = sadd.s32 4294967294, %s833_s15   ;;  %s833_s15 = sphi %s870_s15, %s1149_s15   ;;  %s829_s14 = sphi %s868_s14, %s1148_s14   ;;  %s825_s13 = sphi %s866_s13, %s1147_s13   ;;  %s821_s12 = sphi %s864_s12, %s1146_s12  }
   0x6   : > { %s889_s18 = sadd.s32 1, %s833_s15   ;;  %s26_s19 = sadd.s32 1, %s829_s14 }
   0x7   : > { %s23_s20 = ssub.s32 %s833_s15, %s889_s18  ;;  %p33_p0 = scmp.ne.s32.totalorder %s829_s14, %s825_s13 }
   0x8   : > { %p24_p1 = scmp.eq.s32.totalorder %s23_s20, 0  ;;  %p34_p2 = scmp.eq.s32.totalorder %s833_s15, 0 }
   0x9   : > { %p39_p3 = scmp.ne.s32.totalorder %s825_s13, %s821_s12  ;;  %p40_p4 = scmp.eq.s32.totalorder %s885_s16, 0 }
   0xa   : > { %s901_s21 = scalar_select %p24_p1, %s829_s14, %s26_s19  }
   0xb   : > { %p903_p5 = por %p34_p2, %p33_p0  ;;  %p907_p6 = por %p40_p4, %p39_p3 }
   0xc   : > { %p105_p7 = scmp.eq.s32.totalorder %s885_s16, 1  ;;  %p111_p8 = scmp.eq.s32.totalorder %s621_s17, 1 }
   0xd   : > { %p692_p10 = scmp.lt.s32.totalorder %s833_s15, 2  ;;  %s137_s26 = sand.u32 1, %s829_s14  }
   0xe   : > { %p914_p11 = por %p105_p7, %p33_p0  ;;  %p918_p12 = por %p111_p8, %p39_p3 }
   0xf   : > { %s646_s27 = sshll.u32 %s833_s15, 11  ;;  %s624_s28 = sshll.u32 %s137_s26, 7 }
  0x10   : > { %s1140_s24 = scalar_select %p914_p11, 1, 0 }
  0x11   : > { %s1141_s25 = scalar_select %p918_p12, 1, 0 }
  0x12   : > { %s927_s4 = scalar_lea.hbm %s1133_s0, %s646_s27  ;;  %s141_s5 = scalar_lea.vmem [#allocation2], %s624_s28 }
  0x13   : > { %s149_s6 = sshll.u32 %s141_s5, 4  ;;  %p931_p13 = pnand %p692_p10, %p903_p5  ;;  %s935_s6 = int_to_ptr.vmem [resolvable:$true] %s149_s6 }
  0x14   : > { %s937_s8 = scalar_lea.sflag [#allocation3], %s137_s26  ;;  %s737_s9 = scalar_lea.hbm %s927_s4, 2048 }
  0x15   : > { %p738_p0 = scmp.ne.s32.totalorder %s927_s4, %s737_s9  ;;  %p739_p1 = pneg %p931_p13 }
  0x16   : > { %s742_s17 = scalar_lea.hbm %s1133_s0, 4096  ;;  %p743_p4 = scmp.lt.u32.totalorder %s927_s4, %s1133_s0 }
  0x17   : > { %p740_p2 = pnand %p739_p1, %p738_p0  ;;  %p744_p5 = scmp.lt.u32.totalorder %s742_s17, %s737_s9 }
  0x18   : > { %p746_p8 = scmp.lt.u32.totalorder %s737_s9, %s927_s4 }
  0x19   : > { %p741_p3 = pneg %p740_p2  ;;  %p745_p7 = por %p744_p5, %p743_p4 }
  0x1b   : > { %p747_p10 = por %p746_p8, %p745_p7 }
  0x1d   : > { %p748_p9 = pnand %p747_p10, %p741_p3 }
  0x1f   : > { %751 = shalt.err (!%p748_p9)
}
  0x20   : > { %s752_s22 = scalar_lea.vmem %s935_s6, 2048  ;;  %s835_s26 = smov [#allocation2]  }
  0x21   : > { %p753_p0 = scmp.ne.s32.totalorder %s935_s6, %s752_s22  ;;  %s757_s27 = sshll.u32 %s835_s26, 4  ;;  %s758_s27 = int_to_ptr.vmem [resolvable:$false] %s757_s27 }
  0x22   : > { %s759_s28 = scalar_lea.vmem %s758_s27, 4096  ;;  %p760_p11 = scmp.lt.s32.totalorder %s935_s6, %s758_s27 }
  0x23   : > { %p755_p2 = pnand %p753_p0, %p739_p1  ;;  %p761_p4 = scmp.lt.s32.totalorder %s759_s28, %s752_s22 }
  0x25   : > { %p756_p12 = pneg %p755_p2  ;;  %p762_p5 = por %p761_p4, %p760_p11 }
  0x27   : > { %p763_p7 = pnand %p762_p5, %p756_p12 }
  0x29   : > { %766 = shalt.err (!%p763_p7)
}
  0x2a   : > { %s836_s29 = smov 256   ;;  %s837_s30 = smov 16  }
  0x2b   : > { %687 = dma.hbm_to_vmem [thread:$0]  (!%p931_p13), %s927_s4, 2048, %s935_s6, %s937_s8, %s836_s29, %s836_s29, %s837_s30  }
  0x2c   : > { %p628_p9 = scmp.ge.s32.totalorder %s833_s15, 1  ;;  %p157_p1 = scmp.lt.s32.totalorder %s833_s15, 3 }
  0x2e   : > { %p158_p3 = pnand %p628_p9, %p157_p1 }
  0x2f   : > { %s968_s5 = sand.u32 (!%p158_p3), 1, %s825_s13  }
  0x30   : > { %161 = sbr.rel (%p158_p3) target bundleno = 822 (0x336), region = 32  ;;  %s629_s9 = sshll.u32 (!%p158_p3), %s968_s5, 7 }
  0x31   : > { %s164_s10 = scalar_lea.sflag (!%p158_p3), [#allocation3], %s968_s5  ;;  %s167_s11 = scalar_lea.vmem (!%p158_p3), [#allocation2], %s629_s9 }
  0x37   : > { %812 = dma.done.wait (%p907_p6), %s164_s10, 2048  }
  0x38   : > { %814 = vsyncadd (%p907_p6), %s164_s10, 4294965248  ;;  %v978_v0 = vld [vmem:[%s167_s11 + $0x40] sm:$0xff]  ;;  %v980_v1 = vld [vmem:[%s167_s11 + $0x48] sm:$0xff]  ;;  %v838_v24 = vmov 0.0   ;;  %vm289_vm0 = vcmask 261120   ;;  %vm839_vm1 = vmmov 0   ;;  %v241_v33 = vlaneseq }
  0x39   : > { %v982_v2 = vld [vmem:[%s167_s11] sm:$0xff]  ;;  %v220_v3 = vmax.f32 %v978_v0, %v980_v1  ;;  %v986_v4 = vld [vmem:[%s167_s11 + $0x8] sm:$0xff]  ;;  %v988_v5 = vld [vmem:[%s167_s11 + $0x50] sm:$0xff]  ;;  %656 = vmatprep.subr.mxu0 %v838_v24  ;;  %658 = vmatprep.mubr.msk.f32.mxu0 %vm839_vm1, %v838_v24  ;;  %vm370_vm2 = vcmask 64512   ;;  %v840_v28 = vmov 0.0|0.0   ;;  %vm252_vm4 = vcmask 130112  }
  0x3a   : > { %v990_v6 = vld [vmem:[%s167_s11 + $0x58] sm:$0xff]  ;;  %v208_v7 = vmax.f32 %v982_v2, %v986_v4  ;;  %v994_v8 = vld [vmem:[%s167_s11 + $0x10] sm:$0xff]  ;;  %v1002_v12 = vld [vmem:[%s167_s11 + $0x60] sm:$0xff]  ;;  %669 = vmatprep.mubr.msk.f32.mxu1 %vm839_vm1, %v838_v24  ;;  %672 = vmatprep.subr.bf16.mxu1 %v840_v28  ;;  %v242_v34 = vand.u32 127, %v241_v33  ;;  %v244_v39 = vshrl.u32 %v241_v33, 7  ;;  %vm259_vm5 = vcmask 195712  }
  0x3b   : > { %v996_v9 = vld [vmem:[%s167_s11 + $0x18] sm:$0xff]  ;;  %221 = vmax.xlane.f32.xlu1 %v220_v3  ;;  %v223_v10 = vmax.f32 %v988_v5, %v990_v6  ;;  %v1004_v13 = vld [vmem:[%s167_s11 + $0x68] sm:$0xff]  ;;  %v1006_v14 = vld [vmem:[%s167_s11 + $0x20] sm:$0xff]  ;;  %vm266_vm6 = vcmask 261312   ;;  %vm287_vm7 = vcmask 1041409   ;;  %s1052_s27 = scalar_lea.vmem [#allocation5], %s629_s9 }
  0x3c   : > { %209 = vmax.xlane.f32.xlu0 %v208_v7  ;;  %v211_v11 = vmax.f32 %v994_v8, %v996_v9  ;;  %v1008_v15 = vld [vmem:[%s167_s11 + $0x28] sm:$0xff]  ;;  %v226_v16 = vmax.f32 %v1002_v12, %v1004_v13  ;;  %v1014_v18 = vld [vmem:[%s167_s11 + $0x70] sm:$0xff]  ;;  %v1016_v19 = vld [vmem:[%s167_s11 + $0x78] sm:$0xff]  ;;  %v247_v37 = vadd.s32 4294967288, %v242_v34  ;;  %v254_v38 = vadd.s32 4294967280, %v242_v34  ;;  %s648_s28 = sshll.u32 %s885_s16, 11 }
  0x3d   : > { %v214_v17 = vmax.f32 %v1006_v14, %v1008_v15  ;;  %v1018_v20 = vld [vmem:[%s167_s11 + $0x30] sm:$0xff]  ;;  %v1020_v21 = vld [vmem:[%s167_s11 + $0x38] sm:$0xff]  ;;  %v229_v22 = vmax.f32 %v1014_v18, %v1016_v19  ;;  %v232_v25 = vld [vmem:[%s1134_s1] sm:$0xff]  ;;  %v261_v43 = vadd.s32 4294967272, %v242_v34  ;;  %v245_v45 = vsub.s32 %v242_v34, %v244_v39  ;;  %s548_s29 = sshll.u32 %s1052_s27, 4  ;;  %s1083_s10 = scalar_lea.hbm %s1136_s3, %s648_s28  ;;  %s1085_s29 = int_to_ptr.vmem [resolvable:$true] %s548_s29 }
  0x3e   : > { %v217_v23 = vmax.f32 %v1018_v20, %v1020_v21  ;;  %657 = vmatpush3.xpose.msk.msra.mxu0 %vm289_vm0, %v232_v25  ;;  %v366_v26 = vld [vmem:[%s1135_s2] sm:$0xff]  ;;  %v367_v27 = vld [vmem:[%s1135_s2 + $0x8] sm:$0xff]  ;;  %vm674_vm3 = vmpackc.low %vm370_vm2, %vm370_vm2  ;;  %v250_v41 = vsub.s32 %v247_v37, %v244_v39  ;;  %v257_v44 = vsub.s32 %v254_v38, %v244_v39  ;;  %s534_s16 = scalar_lea.sflag [#allocation4], %s968_s5  ;;  %s767_s11 = scalar_lea.vmem %s1085_s29, 2048 }
  0x3f   : > { %224 = vmax.xlane.f32.xlu1 %v223_v10  ;;  %v673_v29 = vpack.c.bf16 %v367_v27, %v366_v26  ;;  %v368_v30 = vld [vmem:[%s1135_s2 + $0x10] sm:$0xff]  ;;  %v369_v31 = vld [vmem:[%s1135_s2 + $0x18] sm:$0xff]  ;;  %v264_v49 = vsub.s32 %v261_v43, %v244_v39  ;;  %v465_v27 = vsub.s32 0, %v244_v39  ;;  %p768_p6 = scmp.ne.s32.totalorder %s1085_s29, %s767_s11  ;;  %p1143_p11 = scmp.ne.s32.totalorder %s1140_s24, 0 }
  0x40   : > { %212 = vmax.xlane.f32.xlu0 %v211_v11  ;;  %v677_v32 = vpack.c.bf16 %v369_v31, %v368_v30  ;;  %v484_v30 = vsub.s32 1, %v244_v39  ;;  %s841_s23 = smov [#allocation5]  }
  0x41   : > { %675 = vmatpush3.bf16.xpose.msk.msra.mxu1 %vm674_vm3, %v673_v29  ;;  %p769_p12 = pnand %p768_p6, %p1143_p11  ;;  %s771_s4 = sshll.u32 %s841_s23, 4  ;;  %s772_s4 = int_to_ptr.vmem [resolvable:$false] %s771_s4 }
  0x42   : > { %676 = vmatprep.subr.bf16.mxu1 %v840_v28  ;;  %s773_s6 = scalar_lea.vmem %s772_s4, 4096  ;;  %p774_p8 = scmp.lt.s32.totalorder %s1085_s29, %s772_s4 }
  0x43   : > { %227 = vmax.xlane.f32.xlu1 %v226_v16  ;;  %p770_p13 = pneg %p769_p12  ;;  %p775_p10 = scmp.lt.s32.totalorder %s773_s6, %s767_s11 }
  0x44   : > { %215 = vmax.xlane.f32.xlu0 %v214_v17 }
  0x45   : > { %p776_p0 = por %p775_p10, %p774_p8 }
  0x47   : > { %230 = vmax.xlane.f32.xlu1 %v229_v22  ;;  %p777_p2 = pnand %p776_p0, %p770_p13 }
  0x48   : > { %218 = vmax.xlane.f32.xlu0 %v217_v23 }
  0x49   : > { %679 = vmatpush3.bf16.xpose.msk.msra.mxu1 %vm674_vm3, %v677_v32 }
  0xc8   : > { %v222_v35 = vpop.xlane.xlu1 %221 }
  0xc9   : > { %v210_v36 = vpop.xlane.xlu0 %209  ;;  %v271_v52 = vrot.slane %v222_v35, %v245_v45 }
  0xca   : > { %v246_v54 = vrot.slane %v210_v36, %v245_v45 }
  0xcc   : > { %v225_v40 = vpop.xlane.xlu1 %224 }
  0xcd   : > { %v213_v42 = vpop.xlane.xlu0 %212  ;;  %v275_v47 = vrot.slane %v225_v40, %v250_v41 }
  0xce   : > { %v251_v50 = vrot.slane %v213_v42, %v250_v41 }
  0xcf   : > { %v276_v56 = vsel %vm252_vm4, %v275_v47, %v271_v52 }
  0xd0   : > { %v228_v46 = vpop.xlane.xlu1 %227  ;;  %v253_v59 = vsel %vm252_vm4, %v251_v50, %v246_v54 }
  0xd1   : > { %v216_v48 = vpop.xlane.xlu0 %215  ;;  %v280_v51 = vrot.slane %v228_v46, %v257_v44 }
  0xd2   : > { %v258_v53 = vrot.slane %v216_v48, %v257_v44 }
  0xd3   : > { %v281_v60 = vsel %vm259_vm5, %v280_v51, %v276_v56 }
  0xd4   : > { %v231_v55 = vpop.xlane.xlu1 %230  ;;  %v260_v62 = vsel %vm259_vm5, %v258_v53, %v253_v59 }
  0xd5   : > { %v285_v57 = vrot.slane %v231_v55, %v264_v49  ;;  %v219_v58 = vpop.xlane.xlu0 %218 }
  0xd6   : > { %v265_v61 = vrot.slane %v219_v58, %v264_v49 }
  0xd7   : > { %v286_v63 = vsel %vm266_vm6, %v285_v57, %v281_v60 }
  0xd8   : > { %v267_v3 = vsel %vm266_vm6, %v265_v61, %v260_v62 }
  0xd9   : > { %v288_v7 = vsel %vm287_vm7, %v286_v63, %v267_v3 }
  0xda   : > { %659 = vmatmul.mubr.msk.f32.vlgmr.msra.gmra.mrb[0].mxu0 %vm289_vm0, %v288_v7 }
 0x1ad   : > { %v361_v10 = vpop.f32.mrb[0].mxu0 }
 0x1ae   : > { %v365_v11 = vmax.f32 %v361_v10, 0.0  ;;  %v660_v16 = vpop.f32.mrb[1].mxu0 }
 0x1b0   : > { %670 = vmatmul.mubr.msk.f32.vlgmr.msra.gmra.mrb[0].mxu1 %vm370_vm2, %v365_v11 }
 0x283   : > { %v452_v17 = vpop.f32.mrb[0].mxu1 }
 0x284   : > { %v638_v22 = vmul.f32 -2.0, %v452_v17  ;;  %v671_v23 = vpop.f32.mrb[1].mxu1 }
 0x286   : > { %v458_v24 = vmul.f32 1.442695, %v638_v22 }
 0x288   : > { %733 = vpow2.f32 %v458_v24 }
 0x292   : > { %v734_v25 = vpop.eup %733 }
 0x293   : > { %v460_v26 = vadd.f32 1.0, %v734_v25 }
 0x295   : > { %735 = vrcp.f32 %v460_v26 }
 0x29f   : > { %v736_v28 = vpop.eup %735 }
 0x2a0   : > { %v466_v29 = vrot.slane %v736_v28, %v465_v27  ;;  %v485_v31 = vrot.slane %v736_v28, %v484_v30 }
 0x2a2   : > { %472 = vbcast.lane.b32.xlu1 %v466_v29, 264  ;;  %468 = vbcast.lane.b32.xlu0 %v466_v29, 256 }
 0x2a6   : > { %476 = vbcast.lane.b32.xlu1 %v466_v29, 272  ;;  %487 = vbcast.lane.b32.xlu0 %v485_v31, 256 }
 0x2aa   : > { %480 = vbcast.lane.b32.xlu1 %v466_v29, 280  ;;  %495 = vbcast.lane.b32.xlu0 %v485_v31, 272 }
 0x2ae   : > { %491 = vbcast.lane.b32.xlu1 %v485_v31, 264 }
 0x2b2   : > { %499 = vbcast.lane.b32.xlu1 %v485_v31, 280 }
 0x314   : > { %v473_v32 = vpop.permute.xlu1 %472  ;;  %v469_v33 = vpop.permute.xlu0 %468 }
 0x315   : > { %v503_v34 = vmul.f32 %v473_v32, %v994_v8  ;;  %v504_v35 = vmul.f32 %v473_v32, %v996_v9  ;;  %v501_v36 = vmul.f32 %v469_v33, %v982_v2  ;;  %v502_v37 = vmul.f32 %v469_v33, %v986_v4 }
 0x317   : > { %519 = vst [vmem:[%s1052_s27 + $0x10] sm:$0xff] %v503_v34  ;;  %520 = vst [vmem:[%s1052_s27 + $0x18] sm:$0xff] %v504_v35 }
 0x318   : > { %517 = vst [vmem:[%s1052_s27] sm:$0xff] %v501_v36  ;;  %518 = vst [vmem:[%s1052_s27 + $0x8] sm:$0xff] %v502_v37  ;;  %v477_v8 = vpop.permute.xlu1 %476  ;;  %v488_v2 = vpop.permute.xlu0 %487 }
 0x319   : > { %v505_v4 = vmul.f32 %v477_v8, %v1006_v14  ;;  %v506_v9 = vmul.f32 %v477_v8, %v1008_v15  ;;  %v509_v38 = vmul.f32 %v488_v2, %v978_v0  ;;  %v510_v39 = vmul.f32 %v488_v2, %v980_v1 }
 0x31b   : > { %521 = vst [vmem:[%s1052_s27 + $0x20] sm:$0xff] %v505_v4  ;;  %522 = vst [vmem:[%s1052_s27 + $0x28] sm:$0xff] %v506_v9 }
 0x31c   : > { %525 = vst [vmem:[%s1052_s27 + $0x40] sm:$0xff] %v509_v38  ;;  %526 = vst [vmem:[%s1052_s27 + $0x48] sm:$0xff] %v510_v39  ;;  %v481_v40 = vpop.permute.xlu1 %480  ;;  %v496_v41 = vpop.permute.xlu0 %495 }
 0x31d   : > { %v507_v14 = vmul.f32 %v481_v40, %v1018_v20  ;;  %v508_v42 = vmul.f32 %v481_v40, %v1020_v21  ;;  %v513_v15 = vmul.f32 %v496_v41, %v1002_v12  ;;  %v514_v0 = vmul.f32 %v496_v41, %v1004_v13 }
 0x31f   : > { %523 = vst [vmem:[%s1052_s27 + $0x30] sm:$0xff] %v507_v14  ;;  %524 = vst [vmem:[%s1052_s27 + $0x38] sm:$0xff] %v508_v42 }
 0x320   : > { %529 = vst [vmem:[%s1052_s27 + $0x60] sm:$0xff] %v513_v15  ;;  %530 = vst [vmem:[%s1052_s27 + $0x68] sm:$0xff] %v514_v0  ;;  %v492_v1 = vpop.permute.xlu1 %491 }
 0x321   : > { %v511_v43 = vmul.f32 %v492_v1, %v988_v5  ;;  %v512_v44 = vmul.f32 %v492_v1, %v990_v6 }
 0x323   : > { %527 = vst [vmem:[%s1052_s27 + $0x50] sm:$0xff] %v511_v43  ;;  %528 = vst [vmem:[%s1052_s27 + $0x58] sm:$0xff] %v512_v44 }
 0x324   : > { %v500_v12 = vpop.permute.xlu1 %499 }
 0x325   : > { %v515_v5 = vmul.f32 %v500_v12, %v1014_v18  ;;  %v516_v13 = vmul.f32 %v500_v12, %v1016_v19 }
 0x327   : > { %531 = vst [vmem:[%s1052_s27 + $0x70] sm:$0xff] %v515_v5  ;;  %532 = vst [vmem:[%s1052_s27 + $0x78] sm:$0xff] %v516_v13 }
 0x328   : > { %780 = shalt.err (!%p777_p2)
}
 0x329   : > { %s781_s7 = scalar_lea.hbm %s1083_s10, 2048  ;;  %s785_s19 = scalar_lea.hbm %s1136_s3, 4096 }
 0x32a   : > { %p782_p4 = scmp.ne.s32.totalorder %s1083_s10, %s781_s7  ;;  %p786_p9 = scmp.lt.u32.totalorder %s1083_s10, %s1136_s3 }
 0x32b   : > { %p787_p1 = scmp.lt.u32.totalorder %s785_s19, %s781_s7  ;;  %p789_p6 = scmp.lt.u32.totalorder %s781_s7, %s1083_s10 }
 0x32c   : > { %p783_p5 = pnand %p782_p4, %p1143_p11 }
 0x32d   : > { %p788_p3 = por %p787_p1, %p786_p9 }
 0x32e   : > { %p784_p7 = pneg %p783_p5 }
 0x32f   : > { %p790_p12 = por %p789_p6, %p788_p3 }
 0x331   : > { %p791_p13 = pnand %p790_p12, %p784_p7 }
 0x333   : > { %794 = shalt.err (!%p791_p13)
}
 0x334   : > { %s842_s26 = smov 256   ;;  %s843_s27 = smov 16  }
 0x335   : > { %682 = dma.vmem_to_hbm [thread:$0]  (%p1143_p11), %s1085_s29, 2048, %s1083_s10, %s534_s16, %s842_s26, %s842_s26, %s843_s27  }
 0x336 PF: > { %s563_s28 = sand.u32 1, %s821_s12   ;;  %p1144_p8 = scmp.ne.s32.totalorder %s1141_s25, 0 }
 0x337   : > { %p1145_p10 = scmp.ge.s32.totalorder %s833_s15, 2  ;;  %s564_s30 = scalar_lea.sflag [#allocation4], %s563_s28 }
 0x339   : > { %p689_p0 = pnand %p1145_p10, %p1144_p8 }
 0x33b   : > { %816 = dma.done.wait (!%p689_p0), %s564_s30, 2048  }
 0x33c   : > { %818 = vsyncadd (!%p689_p0), %s564_s30, 4294965248  ;;  %p16_p2 = scmp.ge.s32.totalorder %s889_s18, 4   ;;  %s1146_s12 = smov %s825_s13 }
 0x33d   : > { %s1147_s13 = smov %s829_s14  ;;  %s1148_s14 = smov %s901_s21 }
 0x33e   : > { %s1149_s15 = smov %s889_s18  ;;  %18 = sbr.rel (!%p16_p2) target bundleno = 5 (0x5), region = 77 }
 0x345   :  { %569 = vsyncpa [#allocation3], 1 }
 0x346   :  { %571 = vsyncpa [#allocation3 + $0x1], 1 }
 0x347   :  { %572 = vsyncpa [#allocation4], 1 }
 0x348   :  { %574 = vsyncpa [#allocation4 + $0x1], 1 }

</bundles_post_ra>
